<compile_context>
chip_gen: v5e
topology: v5e:2x2
jax: 0.10.0
libtpu: 0.0.40
codegen_flags: <defaults>
</compile_context>

<pallas_src>
import functools

import jax
import jax.numpy as jnp
from jax.experimental import pallas as pl
from jax.experimental.pallas import tpu as pltpu

EPS = 1e-5

# ------------------------------------------------------------- tiling utils --

_vmem_limit_cache = None


def _vmem_limit_bytes():
    """Scoped-VMEM ceiling: ~3/4 of physical VMEM, capped at 96 MiB.

    v5e/v6e (128 MiB physical) -> 96 MiB; v7x (64 MiB) -> 48 MiB; unknown -> 48 MiB.
    """
    global _vmem_limit_cache
    if _vmem_limit_cache is None:
        cap = 64 * 1024 * 1024          # conservative fallback (v7x-sized)
        try:
            cap = int(pltpu.get_tpu_info().vmem_capacity_bytes)
        except Exception:
            pass
        _vmem_limit_cache = min(96 * 1024 * 1024, (cap * 3) // 4)
    return _vmem_limit_cache


def _round_up(x, m):
    return ((x + m - 1) // m) * m


def _sub_mult(dtype):
    """Sublane multiple including packing: 8 (f32), 16 (bf16), 32 (int8/fp8)."""
    return 8 * max(1, 4 // jnp.dtype(dtype).itemsize)


def _pick_tiles(n_rows, n_cols, sub_mult, bytes_per_elem, block_budget,
                split_rows=True):
    """Pick (row_tile, col_tile).

    row_tile is a multiple of `sub_mult` (or the full row extent); col_tile is a
    multiple of 128 (or the full lane extent).  Sizing uses the lane-padded
    footprint so H*W < 128 doesn't blow VMEM, and `bytes_per_elem` should include
    the in-kernel f32 temporaries plus double-buffered in/out copies.
    """
    padded_cols = _round_up(n_cols, 128)
    max_elems = max(block_budget // bytes_per_elem, sub_mult * 128)
    if sub_mult * padded_cols <= max_elems:
        # Full rows fit: tile along rows only.
        col_tile = n_cols
        row_tile = (max_elems // padded_cols) // sub_mult * sub_mult
        if row_tile >= n_rows:
            row_tile = n_rows
            # Keep >= 2 blocks on the "parallel" row axis when possible so v7x's
            # two TensorCores both get work (one extra tiny step on v5e/v6e).
            if split_rows and n_rows >= 2 * sub_mult:
                row_tile = _round_up((n_rows + 1) // 2, sub_mult)
    else:
        # Huge rows: keep a sublane-packed row tile and tile the lane axis.
        row_tile = min(sub_mult, n_rows)
        col_tile = max(128, (max_elems // sub_mult) // 128 * 128)
        if col_tile >= n_cols:
            col_tile = n_cols
    return row_tile, col_tile


# ---------------------------------------------------------------- kernels ----

def _row_stats_kernel(x_ref, sum_ref, ssq_ref, *, n_cols, col_tile):
    """Accumulate per-row sum and sum-of-squares across the column grid axis."""
    j = pl.program_id(1)

    @pl.when(j == 0)
    def _():
        sum_ref[...] = jnp.zeros_like(sum_ref)
        ssq_ref[...] = jnp.zeros_like(ssq_ref)

    x = x_ref[...].astype(jnp.float32)
    if n_cols % col_tile != 0:
        # Mask out-of-range columns of the partial last block (padding is undefined).
        col = j * col_tile + jax.lax.broadcasted_iota(jnp.int32, x.shape, 1)
        x = jnp.where(col < n_cols, x, 0.0)
    sum_ref[...] += jnp.sum(x, axis=-1, keepdims=True)
    ssq_ref[...] += jnp.sum(x * x, axis=-1, keepdims=True)


def _scale_shift_kernel(x_ref, a_ref, s_ref, o_ref):
    """o = x * a + s with per-row (row_tile,1) or per-lane (1,col_tile) a, s.

    NOTE: partial edge blocks read undefined padding and rely on Pallas discarding
    out-of-range output elements on write-back; do not turn this into an
    accumulating output without adding explicit masking.
    """
    o_ref[...] = (x_ref[...].astype(jnp.float32) * a_ref[...]
                  + s_ref[...]).astype(o_ref.dtype)


def _instancenorm_kernel(x_ref, o_ref):
    """Single-pass per-row normalization (full row resident in VMEM).

    Variance via E[x^2] - E[x]^2 in one sweep: no full-block (x - mean) temp.
    """
    x = x_ref[...].astype(jnp.float32)
    inv_n = 1.0 / x.shape[-1]
    mean = jnp.sum(x, axis=-1, keepdims=True) * inv_n
    ex2 = jnp.sum(x * x, axis=-1, keepdims=True) * inv_n
    var = jnp.maximum(ex2 - mean * mean, 0.0)      # biased variance
    inv = jax.lax.rsqrt(var + EPS)
    o_ref[...] = ((x - mean) * inv).astype(o_ref.dtype)


def _batchnorm_fused_kernel(x_ref, w_ref, b_ref, o_ref):
    """Fully fused batchnorm for a whole (N, C, H*W) slab resident in VMEM.

    Reads x from HBM once and writes once (2x traffic vs 3x for the two-pass path).
    """
    x = x_ref[...].astype(jnp.float32)              # (N, C, HW)
    inv_cnt = 1.0 / (x.shape[0] * x.shape[2])
    s = jnp.sum(jnp.sum(x, axis=2, keepdims=True), axis=0, keepdims=True)    # (1,C,1)
    ssq = jnp.sum(jnp.sum(x * x, axis=2, keepdims=True), axis=0, keepdims=True)
    mean = s * inv_cnt
    var = jnp.maximum(ssq * inv_cnt - mean * mean, 0.0)   # biased variance
    a = w_ref[...].astype(jnp.float32) * jax.lax.rsqrt(var + EPS)
    off = b_ref[...].astype(jnp.float32) - mean * a
    o_ref[...] = (x * a + off).astype(o_ref.dtype)


# ------------------------------------------------------------ pallas calls ----

def _row_stats(x2, row_tile, col_tile):
    n_rows, n_cols = x2.shape
    grid = (pl.cdiv(n_rows, row_tile), pl.cdiv(n_cols, col_tile))
    kernel = functools.partial(_row_stats_kernel, n_cols=n_cols, col_tile=col_tile)
    return pl.pallas_call(
        kernel,
        out_shape=(jax.ShapeDtypeStruct((n_rows, 1), jnp.float32),
                   jax.ShapeDtypeStruct((n_rows, 1), jnp.float32)),
        grid=grid,
        in_specs=[pl.BlockSpec((row_tile, col_tile), lambda i, j: (i, j))],
        out_specs=(pl.BlockSpec((row_tile, 1), lambda i, j: (i, 0)),
                   pl.BlockSpec((row_tile, 1), lambda i, j: (i, 0))),
        compiler_params=pltpu.CompilerParams(
            dimension_semantics=("parallel", "arbitrary"),
            vmem_limit_bytes=_vmem_limit_bytes()),
    )(x2)


def _scale_shift(x2, a, s, row_tile, col_tile, a_along_rows):
    """o = x*a + s.  a/s are (n_rows,1) when a_along_rows else (1,n_cols)."""
    n_rows, n_cols = x2.shape
    grid = (pl.cdiv(n_rows, row_tile), pl.cdiv(n_cols, col_tile))
    if a_along_rows:
        a_spec = pl.BlockSpec((row_tile, 1), lambda i, j: (i, 0))
    else:
        a_spec = pl.BlockSpec((1, col_tile), lambda i, j: (0, j))
    return pl.pallas_call(
        _scale_shift_kernel,
        out_shape=jax.ShapeDtypeStruct((n_rows, n_cols), x2.dtype),
        grid=grid,
        in_specs=[pl.BlockSpec((row_tile, col_tile), lambda i, j: (i, j)),
                  a_spec, a_spec],
        out_specs=pl.BlockSpec((row_tile, col_tile), lambda i, j: (i, j)),
        compiler_params=pltpu.CompilerParams(
            dimension_semantics=("parallel", "parallel"),
            vmem_limit_bytes=_vmem_limit_bytes()),
    )(x2, a, s)


def _instancenorm_fused(x2, row_tile):
    n_rows, n_cols = x2.shape
    grid = (pl.cdiv(n_rows, row_tile),)
    return pl.pallas_call(
        _instancenorm_kernel,
        out_shape=jax.ShapeDtypeStruct((n_rows, n_cols), x2.dtype),
        grid=grid,
        in_specs=[pl.BlockSpec((row_tile, n_cols), lambda i: (i, 0))],
        out_specs=pl.BlockSpec((row_tile, n_cols), lambda i: (i, 0)),
        compiler_params=pltpu.CompilerParams(
            dimension_semantics=("parallel",),
            vmem_limit_bytes=_vmem_limit_bytes()),
    )(x2)


def _batchnorm_fused(x3, weight, bias):
    N, C, HW = x3.shape
    w3 = weight.astype(jnp.float32).reshape(1, C, 1)
    b3 = bias.astype(jnp.float32).reshape(1, C, 1)
    return pl.pallas_call(
        _batchnorm_fused_kernel,
        out_shape=jax.ShapeDtypeStruct((N, C, HW), x3.dtype),
        grid=(1,),
        in_specs=[pl.BlockSpec((N, C, HW), lambda i: (0, 0, 0)),
                  pl.BlockSpec((1, C, 1), lambda i: (0, 0, 0)),
                  pl.BlockSpec((1, C, 1), lambda i: (0, 0, 0))],
        out_specs=pl.BlockSpec((N, C, HW), lambda i: (0, 0, 0)),
        compiler_params=pltpu.CompilerParams(
            dimension_semantics=("arbitrary",),
            vmem_limit_bytes=_vmem_limit_bytes()),
    )(x3, w3, b3)


# --------------------------------------------------------------- wrapper ----

def norm_layer(x, norm_type, weight=None, bias=None, *, _force_two_pass=False):
    """Forward pass of NormLayer. x is NCHW."""
    if norm_type == 'none':
        return x

    N, C, H, W = x.shape
    n_rows, n_cols = N * C, H * W
    item = jnp.dtype(x.dtype).itemsize
    sub = _sub_mult(x.dtype)
    block_budget = (_vmem_limit_bytes() * 3) // 4   # leave headroom under the limit

    if norm_type == 'instancenorm':
        x2 = x.reshape(n_rows, n_cols)
        # Fused kernel working set per element: 2x in + 2x out double buffers + f32 temps.
        fused_cost = 2 * item + 2 * item + 8
        row_tile, col_tile = _pick_tiles(n_rows, n_cols, sub, fused_cost, block_budget)
        if col_tile == n_cols and not _force_two_pass:
            out2 = _instancenorm_fused(x2, row_tile)
        else:
            # Huge H*W: two-pass (column-accumulated stats + fused scale/shift).
            # TODO(synk): with H*W < 128 this two-pass path has lane-narrow blocks; in
            # practice such tensors always take the fused path above.
            rs_rt, rs_ct = _pick_tiles(n_rows, n_cols, sub, 2 * item + 4, block_budget)
            row_sum, row_ssq = _row_stats(x2, rs_rt, rs_ct)
            cnt = float(n_cols)
            mean = row_sum / cnt
            var = jnp.maximum(row_ssq / cnt - mean * mean, 0.0)
            a = jax.lax.rsqrt(var + EPS)
            ss_rt, ss_ct = _pick_tiles(n_rows, n_cols, sub, 4 * item + 4, block_budget)
            out2 = _scale_shift(x2, a, -mean * a, ss_rt, ss_ct, a_along_rows=True)
        return out2.reshape(N, C, H, W)

    if norm_type == 'batchnorm':
        if weight is None:
            weight = jnp.ones((C,), jnp.float32)   # nn.BatchNorm2d default affine init
        if bias is None:
            bias = jnp.zeros((C,), jnp.float32)

        # Fully fused single-pass path when the whole (lane/sublane padded) slab fits.
        padded_total = N * _round_up(C, sub) * _round_up(n_cols, 128)
        fused_cost = 2 * item + 2 * item + 12
        if padded_total * fused_cost <= block_budget and not _force_two_pass:
            out3 = _batchnorm_fused(x.reshape(N, C, n_cols), weight, bias)
            return out3.reshape(N, C, H, W)

        # Two-pass path for large tensors.
        x2 = x.reshape(n_rows, n_cols)
        rs_rt, rs_ct = _pick_tiles(n_rows, n_cols, sub, 2 * item + 4, block_budget)
        row_sum, row_ssq = _row_stats(x2, rs_rt, rs_ct)
        # Tiny (N*C)-element per-channel combine: plain-JAX glue.
        ch_sum = row_sum.reshape(N, C).sum(axis=0)
        ch_ssq = row_ssq.reshape(N, C).sum(axis=0)
        cnt = float(N * n_cols)
        mean = ch_sum / cnt
        var = jnp.maximum(ch_ssq / cnt - mean * mean, 0.0)   # biased variance
        a_ch = weight.astype(jnp.float32) * jax.lax.rsqrt(var + EPS)
        s_ch = bias.astype(jnp.float32) - mean * a_ch

        if n_cols < 128:
            # Lane-dense output for tiny spatial: (N, C*H*W) view with per-lane a/s.
            xl = x.reshape(N, C * n_cols)
            a_lane = jnp.repeat(a_ch, n_cols).reshape(1, C * n_cols)
            s_lane = jnp.repeat(s_ch, n_cols).reshape(1, C * n_cols)
            rt, ct = _pick_tiles(N, C * n_cols, sub, 4 * item + 4, block_budget)
            outl = _scale_shift(xl, a_lane, s_lane, rt, ct, a_along_rows=False)
            return outl.reshape(N, C, H, W)

        a_rows = jnp.broadcast_to(a_ch[None, :], (N, C)).reshape(n_rows, 1)
        s_rows = jnp.broadcast_to(s_ch[None, :], (N, C)).reshape(n_rows, 1)
        ss_rt, ss_ct = _pick_tiles(n_rows, n_cols, sub, 4 * item + 4, block_budget)
        out2 = _scale_shift(x2, a_rows, s_rows, ss_rt, ss_ct, a_along_rows=True)
        return out2.reshape(N, C, H, W)

    raise ValueError(
        "Please specify a norm type from the set {batchnorm, instancenorm, none}")


# ----------------------------------------------------------------- main ----

if __name__ == "__main__":
    key = jax.random.PRNGKey(0)
    N, C, H, W = 2, 4, 16, 16
    x = jax.random.normal(key, (N, C, H, W), dtype=jnp.float32)

    # Deterministic parameter init matching nn.BatchNorm2d defaults.
    weight = jnp.ones((C,), jnp.float32)
    bias = jnp.zeros((C,), jnp.float32)

    def ref_batchnorm(x, w, b):
        m = jnp.mean(x, axis=(0, 2, 3), keepdims=True)
        v = jnp.mean((x - m) ** 2, axis=(0, 2, 3), keepdims=True)
        c = x.shape[1]
        return (x - m) / jnp.sqrt(v + EPS) * w.reshape(1, c, 1, 1) + b.reshape(1, c, 1, 1)

    def ref_instancenorm(x):
        m = jnp.mean(x, axis=(2, 3), keepdims=True)
        v = jnp.mean((x - m) ** 2, axis=(2, 3), keepdims=True)
        return (x - m) / jnp.sqrt(v + EPS)

    # Fused paths (default dispatch for small tensors).
    out_bn = jax.block_until_ready(norm_layer(x, 'batchnorm', weight, bias))
    out_in = jax.block_until_ready(norm_layer(x, 'instancenorm'))
    out_none = jax.block_until_ready(norm_layer(x, 'none'))

    # Two-pass (large-tensor) paths, forced at small shapes for coverage.
    out_bn2 = jax.block_until_ready(
        norm_layer(x, 'batchnorm', weight, bias, _force_two_pass=True))
    out_in2 = jax.block_until_ready(
        norm_layer(x, 'instancenorm', _force_two_pass=True))

    # H*W < 128 lane-dense batchnorm scale/shift path.
    x_small = jax.random.normal(jax.random.PRNGKey(0), (2, 4, 7, 7), dtype=jnp.float32)
    out_bn_s = jax.block_until_ready(
        norm_layer(x_small, 'batchnorm', weight, bias, _force_two_pass=True))

    assert jnp.allclose(out_bn, ref_batchnorm(x, weight, bias), atol=1e-4, rtol=1e-4)
    assert jnp.allclose(out_bn2, ref_batchnorm(x, weight, bias), atol=1e-4, rtol=1e-4)
    assert jnp.allclose(out_in, ref_instancenorm(x), atol=1e-4, rtol=1e-4)
    assert jnp.allclose(out_in2, ref_instancenorm(x), atol=1e-4, rtol=1e-4)
    assert jnp.allclose(out_bn_s, ref_batchnorm(x_small, weight, bias), atol=1e-4, rtol=1e-4)
    assert jnp.allclose(out_none, x)

    print("KERNEL_OK")
</pallas_src>

<mosaic_0001>
module attributes {stable_mosaic.version = 11 : i64} {
  func.func @_batchnorm_fused_kernel(%arg0: i32, %arg1: memref<2x4x256xf32, #tpu.memory_space<vmem>>, %arg2: memref<1x4x1xf32, #tpu.memory_space<vmem>>, %arg3: memref<1x4x1xf32, #tpu.memory_space<vmem>>, %arg4: memref<2x4x256xf32, #tpu.memory_space<vmem>>) attributes {dimension_semantics = [#tpu.dimension_semantics<arbitrary>], iteration_bounds = array<i64: 1>, scalar_prefetch = 0 : i64, scratch_operands = 0 : i64, tpu.core_type = #tpu.core_type<tc>, window_params = [{pipeline_mode = #tpu.pipeline_mode<synchronous>, transform_indices = @transform_0, window_bounds = array<i64: 2, 4, 256>}, {pipeline_mode = #tpu.pipeline_mode<synchronous>, transform_indices = @transform_1, window_bounds = array<i64: 1, 4, 1>}, {pipeline_mode = #tpu.pipeline_mode<synchronous>, transform_indices = @transform_2, window_bounds = array<i64: 1, 4, 1>}, {pipeline_mode = #tpu.pipeline_mode<synchronous>, transform_indices = @transform_3, window_bounds = array<i64: 2, 4, 256>}]} {
    %c0 = arith.constant 0 : index
    %c0_0 = arith.constant 0 : index
    %c0_1 = arith.constant 0 : index
    %0 = vector.load %arg1[%c0, %c0_0, %c0_1] : memref<2x4x256xf32, #tpu.memory_space<vmem>>, vector<2x4x256xf32>
    %cst = arith.constant dense<0.000000e+00> : vector<2x4xf32>
    %1 = vector.multi_reduction <add>, %0, %cst [2] : vector<2x4x256xf32> to vector<2x4xf32>
    %2 = vector.shape_cast %1 : vector<2x4xf32> to vector<2x4x1xf32>
    %cst_2 = arith.constant dense<0.000000e+00> : vector<4x1xf32>
    %3 = vector.multi_reduction <add>, %2, %cst_2 [0] : vector<2x4x1xf32> to vector<4x1xf32>
    %4 = vector.shape_cast %3 : vector<4x1xf32> to vector<1x4x1xf32>
    %5 = arith.mulf %0, %0 : vector<2x4x256xf32>
    %cst_3 = arith.constant dense<0.000000e+00> : vector<2x4xf32>
    %6 = vector.multi_reduction <add>, %5, %cst_3 [2] : vector<2x4x256xf32> to vector<2x4xf32>
    %7 = vector.shape_cast %6 : vector<2x4xf32> to vector<2x4x1xf32>
    %cst_4 = arith.constant dense<0.000000e+00> : vector<4x1xf32>
    %8 = vector.multi_reduction <add>, %7, %cst_4 [0] : vector<2x4x1xf32> to vector<4x1xf32>
    %9 = vector.shape_cast %8 : vector<4x1xf32> to vector<1x4x1xf32>
    %cst_5 = arith.constant 0.001953125 : f32
    %10 = vector.broadcast %cst_5 : f32 to vector<1x4x1xf32>
    %11 = arith.mulf %4, %10 : vector<1x4x1xf32>
    %cst_6 = arith.constant 0.001953125 : f32
    %12 = vector.broadcast %cst_6 : f32 to vector<1x4x1xf32>
    %13 = arith.mulf %9, %12 : vector<1x4x1xf32>
    %14 = arith.mulf %11, %11 : vector<1x4x1xf32>
    %15 = arith.subf %13, %14 : vector<1x4x1xf32>
    %cst_7 = arith.constant 0.000000e+00 : f32
    %16 = vector.broadcast %cst_7 : f32 to vector<1x4x1xf32>
    %17 = arith.maximumf %15, %16 : vector<1x4x1xf32>
    %c0_8 = arith.constant 0 : index
    %c0_9 = arith.constant 0 : index
    %c0_10 = arith.constant 0 : index
    %18 = vector.load %arg2[%c0_8, %c0_9, %c0_10] : memref<1x4x1xf32, #tpu.memory_space<vmem>>, vector<1x4x1xf32>
    %cst_11 = arith.constant 9.99999974E-6 : f32
    %19 = vector.broadcast %cst_11 : f32 to vector<1x4x1xf32>
    %20 = arith.addf %17, %19 : vector<1x4x1xf32>
    %21 = math.rsqrt %20 : vector<1x4x1xf32>
    %22 = arith.mulf %18, %21 : vector<1x4x1xf32>
    %c0_12 = arith.constant 0 : index
    %c0_13 = arith.constant 0 : index
    %c0_14 = arith.constant 0 : index
    %23 = vector.load %arg3[%c0_12, %c0_13, %c0_14] : memref<1x4x1xf32, #tpu.memory_space<vmem>>, vector<1x4x1xf32>
    %24 = arith.mulf %11, %22 : vector<1x4x1xf32>
    %25 = arith.subf %23, %24 : vector<1x4x1xf32>
    %26 = vector.broadcast %22 : vector<1x4x1xf32> to vector<2x4x256xf32>
    %27 = arith.mulf %0, %26 : vector<2x4x256xf32>
    %28 = vector.broadcast %25 : vector<1x4x1xf32> to vector<2x4x256xf32>
    %29 = arith.addf %27, %28 : vector<2x4x256xf32>
    %c0_15 = arith.constant 0 : index
    %c0_16 = arith.constant 0 : index
    %c0_17 = arith.constant 0 : index
    %30 = vector.load %arg4[%c0_15, %c0_16, %c0_17] : memref<2x4x256xf32, #tpu.memory_space<vmem>>, vector<2x4x256xf32>
    tpu.vector_store %arg4[%c0_15, %c0_16, %c0_17], %29 {strides = array<i32>} : memref<2x4x256xf32, #tpu.memory_space<vmem>>, vector<2x4x256xf32>,
    return
  }
  func.func @transform_0(%arg0: i32) -> (i32, i32, i32) {
    %c0_i32 = arith.constant 0 : i32
    %c0_i32_0 = arith.constant 0 : i32
    %c0_i32_1 = arith.constant 0 : i32
    %c0_i32_2 = arith.constant 0 : i32
    return %c0_i32, %c0_i32_0, %c0_i32_1 : i32, i32, i32
  }
  func.func @transform_1(%arg0: i32) -> (i32, i32, i32) {
    %c0_i32 = arith.constant 0 : i32
    %c0_i32_0 = arith.constant 0 : i32
    %c0_i32_1 = arith.constant 0 : i32
    %c0_i32_2 = arith.constant 0 : i32
    return %c0_i32, %c0_i32_0, %c0_i32_1 : i32, i32, i32
  }
  func.func @transform_2(%arg0: i32) -> (i32, i32, i32) {
    %c0_i32 = arith.constant 0 : i32
    %c0_i32_0 = arith.constant 0 : i32
    %c0_i32_1 = arith.constant 0 : i32
    %c0_i32_2 = arith.constant 0 : i32
    return %c0_i32, %c0_i32_0, %c0_i32_1 : i32, i32, i32
  }
  func.func @transform_3(%arg0: i32) -> (i32, i32, i32) {
    %c0_i32 = arith.constant 0 : i32
    %c0_i32_0 = arith.constant 0 : i32
    %c0_i32_1 = arith.constant 0 : i32
    %c0_i32_2 = arith.constant 0 : i32
    return %c0_i32, %c0_i32_0, %c0_i32_1 : i32, i32, i32
  }
}

</mosaic_0001>

<bundles_post_ra>
// kernel: tpu_custom_call.1
= control target key start
LH: loop header
LB: loop body
LE: loop exit
PB: predicated region body
PF: predicated region fallthrough
CT: control target
= control target key end

     0   :  { %8 = vsyncpa [#allocation3], 0  ;;  %s282_s0 = inlined_call_operand.hbm [shape: f32[2,4,256], index: 0, kind: input, shape index: {}]   ;;  %s283_s1 = inlined_call_operand.vmem [shape: f32[1,4,1], index: 1, kind: input, shape index: {}]   ;;  %s284_s2 = inlined_call_operand.vmem [shape: f32[1,4,1], index: 2, kind: input, shape index: {}]   ;;  %s285_s3 = inlined_call_operand.hbm [shape: f32[2,4,256], index: 3, kind: output, shape index: {}]  }
   0x1   :  { %9 = vsyncpa [#allocation4], 0  ;;  %s14_s14 = sshll.u32 %s282_s0, 4  ;;  %s214_s15 = smov [#allocation2]   ;;  %s15_s14 = int_to_ptr.hbm [resolvable:$true] %s14_s14 }
   0x2   :  { %s16_s16 = sshll.u32 %s214_s15, 4  ;;  %s215_s17 = smov 128   ;;  %s17_s16 = int_to_ptr.vmem [resolvable:$true] %s16_s16 }
   0x3   :  { %s216_s18 = smov 8  }
   0x4   :  { %22 = dma.hbm_to_vmem [thread:$0]  %s15_s14, 256, %s17_s16, [#allocation3], %s215_s17, %s215_s17, %s216_s18  }
   0x5   :  { %210 = dma.done.wait [#allocation3], 256  }
   0x6   :  { %211 = vsyncadd [#allocation3], 4294967040  ;;  %v246_v0 = vld [vmem:[#allocation2] sm:$0xff]  ;;  %v248_v1 = vld [vmem:[#allocation2 + $0x8] sm:$0xff]  ;;  %vm46_vm0 = vcmask 1043456   ;;  %v217_v25 = vmov 0  }
   0x7   :  { %35 = vst [vmem:[#allocation1] ss:$2 sm:$0xff] %v246_v0  ;;  %v60_v2 = vmul.f32 %v246_v0, %v246_v0  ;;  %v61_v3 = vmul.f32 %v248_v1, %v248_v1  ;;  %158 = vset.pattern.permute.xlu2 %v217_v25  ;;  %159 = vset.pattern.permute.xlu0 %v217_v25  ;;  %v93_v46 = vld [vmem:[%s283_s1] sm:$0xf]  ;;  %v218_v53 = vmov 839922192  }
   0x8   :  { %39 = vst [vmem:[#allocation1 + $0x10] ss:$2 sm:$0xff] %v248_v1  ;;  %v106_v51 = vld [vmem:[%s284_s2] sm:$0xf]  ;;  %v114_v54 = vunpack.c.l.s4 %v218_v53  ;;  %s219_s1 = smov [#allocation5]   ;;  %s139_s25 = sshll.u32 %s285_s3, 4  ;;  %s140_s25 = int_to_ptr.hbm [resolvable:$true] %s139_s25 }
   0x9   :  { %s137_s22 = sshll.u32 %s219_s1, 4  ;;  %s138_s22 = int_to_ptr.vmem [resolvable:$true] %s137_s22 }
   0xa   :  { %v115_v56 = vunpack.c.0.s8 %v114_v54 }
   0xe   :  { %v36_v4 = vld.sshfl [vmem:[#allocation1] sm:$0xff pattern:$0x75316420]  ;;  %v37_v5 = vld.sshfl [vmem:[#allocation1 + $0x8] sm:$0xff pattern:$0x75316420] }
   0xf   :  { %v47_v6 = vsel %vm46_vm0, %v36_v4, 0.0  ;;  %v48_v7 = vsel %vm46_vm0, %v37_v5, 0.0  ;;  %64 = vst [vmem:[#allocation1] ss:$2 sm:$0xff] %v60_v2 }
  0x10   :  { %v49_v8 = vadd.f32 %v48_v7, %v47_v6  ;;  %v40_v9 = vld.sshfl [vmem:[#allocation1 + $0x10] sm:$0xff pattern:$0x75316420]  ;;  %v41_v10 = vld.sshfl [vmem:[#allocation1 + $0x18] sm:$0xff pattern:$0x75316420] }
  0x11   :  { %68 = vst [vmem:[#allocation1 + $0x10] ss:$2 sm:$0xff] %v61_v3  ;;  %v52_v11 = vsel %vm46_vm0, %v40_v9, 0.0  ;;  %v53_v12 = vsel %vm46_vm0, %v41_v10, 0.0 }
  0x12   :  { %50 = vadd.xlane.f32.xlu0 %v49_v8  ;;  %v54_v15 = vadd.f32 %v53_v12, %v52_v11 }
  0x16   :  { %v65_v13 = vld.sshfl [vmem:[#allocation1] sm:$0xff pattern:$0x75316420]  ;;  %v66_v14 = vld.sshfl [vmem:[#allocation1 + $0x8] sm:$0xff pattern:$0x75316420] }
  0x17   :  { %v75_v16 = vsel %vm46_vm0, %v65_v13, 0.0  ;;  %v76_v17 = vsel %vm46_vm0, %v66_v14, 0.0 }
  0x18   :  { %v77_v18 = vadd.f32 %v76_v17, %v75_v16  ;;  %v69_v19 = vld.sshfl [vmem:[#allocation1 + $0x10] sm:$0xff pattern:$0x75316420]  ;;  %v70_v20 = vld.sshfl [vmem:[#allocation1 + $0x18] sm:$0xff pattern:$0x75316420] }
  0x19   :  { %v80_v21 = vsel %vm46_vm0, %v69_v19, 0.0  ;;  %v81_v22 = vsel %vm46_vm0, %v70_v20, 0.0 }
  0x1a   :  { %78 = vadd.xlane.f32.xlu1 %v77_v18  ;;  %55 = vadd.xlane.f32.xlu0 %v54_v15  ;;  %v82_v23 = vadd.f32 %v81_v22, %v80_v21 }
  0x22   :  { %83 = vadd.xlane.f32.xlu1 %v82_v23 }
  0x85   :  { %v51_v24 = vpop.xlane.xlu0 %50 }
  0x86   :  { %v57_v29 = vsel %vm46_vm0, %v51_v24, 0.0 }
  0x8d   :  { %v79_v26 = vpop.xlane.xlu1 %78  ;;  %v56_v27 = vpop.xlane.xlu0 %55 }
  0x8e   :  { %v58_v28 = vsel %vm46_vm0, %v56_v27, 0.0  ;;  %v85_v33 = vsel %vm46_vm0, %v79_v26, 0.0 }
  0x8f   :  { %v59_v30 = vadd.f32 %v58_v28, %v57_v29 }
  0x91   :  { %v88_v31 = vmul.f32 0.001953125, %v59_v30 }
  0x93   :  { %v90_v36 = vmul.f32 %v88_v31, %v88_v31 }
  0x95   :  { %v84_v32 = vpop.xlane.xlu1 %83 }
  0x96   :  { %v86_v34 = vsel %vm46_vm0, %v84_v32, 0.0 }
  0x97   :  { %v87_v35 = vadd.f32 %v86_v34, %v85_v33 }
  0x99   :  { %v89_v37 = vmul.f32 0.001953125, %v87_v35 }
  0x9b   :  { %v91_v38 = vsub.f32 %v89_v37, %v90_v36 }
  0x9d   :  { %v92_v39 = vmax.f32 %v91_v38, 0.0 }
  0x9f   :  { %v94_v40 = vadd.f32 1e-05, %v92_v39 }
  0xa1   :  { %160 = vrsqrt.f32 %v94_v40  ;;  %vm101_vm2 = vweird.f32 %v94_v40 }
  0xa7   :  { %v161_v41 = vpop.eup %160 }
  0xa8   :  { %v96_v42 = vmul.f32 %v161_v41, %v94_v40  ;;  %vm102_vm1 = vweird.f32 %v161_v41 }
  0xa9   :  { %vm103_vm3 = vmor %vm101_vm2, %vm102_vm1 }
  0xaa   :  { %v97_v43 = vmul.f32 %v161_v41, %v96_v42 }
  0xac   :  { %v98_v44 = vmul.f32 0.5, %v97_v43 }
  0xae   :  { %v99_v45 = vsub.f32 1.5, %v98_v44 }
  0xb0   :  { %v100_v47 = vmul.f32 %v161_v41, %v99_v45 }
  0xb2   :  { %v104_v48 = vsel %vm103_vm3, %v161_v41, %v100_v47 }
  0xb3   :  { %v105_v49 = vmul.f32 %v104_v48, %v93_v46 }
  0xb5   :  { %111 = vperm.xlu2 %158, %v105_v49   ;;  %v107_v50 = vmul.f32 %v105_v49, %v88_v31 }
  0xb7   :  { %v108_v52 = vsub.f32 %v106_v51, %v107_v50 }
  0xbd   :  { %122 = vperm.xlu2 %158, %v108_v52  }
 0x10f   :  { %v112_v55 = vpop.permute.xlu2 %111 }
 0x110   :  { %v116_v57 = vperm.slane %v112_v55, %v115_v56 }
 0x112   :  { %v118_v59 = vmul.f32 %v116_v57, %v246_v0  ;;  %v119_v60 = vmul.f32 %v116_v57, %v248_v1 }
 0x117   :  { %v123_v58 = vpop.permute.xlu2 %122 }
 0x118   :  { %v127_v61 = vperm.slane %v123_v58, %v115_v56 }
 0x11a   :  { %v129_v62 = vadd.f32 %v127_v61, %v118_v59  ;;  %v130_v63 = vadd.f32 %v127_v61, %v119_v60 }
 0x11c   :  { %131 = vst [vmem:[#allocation5] sm:$0xff] %v129_v62 }
 0x11d   :  { %132 = vst [vmem:[#allocation5 + $0x8] sm:$0xff] %v130_v63 }
 0x11e   :  { %145 = dma.vmem_to_hbm [thread:$0]  %s138_s22, 256, %s140_s25, [#allocation4], %s215_s17, %s215_s17, %s216_s18  }
 0x11f   :  { %212 = dma.done.wait [#allocation4], 256  }
 0x120   :  { %213 = vsyncadd [#allocation4], 4294967040 }
 0x121   :  { %150 = vsyncpa [#allocation3], 1 }
 0x122   :  { %151 = vsyncpa [#allocation4], 1 }

</bundles_post_ra>
